<compile_context>
chip_gen: v6e
topology: v6e:2x2x1
jax: 0.10.0
libtpu: 0.0.40
codegen_flags: <defaults>
</compile_context>

<pallas_src>
import functools

import jax
import jax.numpy as jnp
from jax.experimental import pallas as pl
from jax.experimental.pallas import tpu as pltpu

IN_DIM = 28 * 28        # 784
HID_DIM = 32
OUT_DIM = 10
OUT_PAD = 128           # lane-dense output width (unmasked vst)
DEFAULT_TM = 4096       # batch tile (multiple of 8)
VMEM_LIMIT_BYTES = 48 * 1024 * 1024


def mlp_kernel(x_ref, w1_ref, b1_ref, w2_ref, b2_ref, o_ref):
    # x_ref:  (TM, 784)  f32   (cast to bf16 here; VPU cast is free when HBM-bound)
    # w1_ref: (784, 32)  bf16  (resident)
    # b1_ref: (1, 32)    f32   (resident)
    # w2_ref: (32, 128)  bf16  (resident, zero-padded cols 10..127)
    # b2_ref: (1, 128)   f32   (resident, zero-padded cols 10..127)
    # o_ref:  (TM, 128)  bf16  (lane-dense slab; wrapper slices [:, :10])
    x_bf16 = x_ref[...].astype(jnp.bfloat16)
    h = jnp.dot(x_bf16, w1_ref[...], preferred_element_type=jnp.float32)
    h = jnp.maximum(h + b1_ref[...], 0.0)                       # bias + ReLU in f32
    y = jnp.dot(h.astype(jnp.bfloat16), w2_ref[...],
                preferred_element_type=jnp.float32)
    o_ref[...] = (y + b2_ref[...]).astype(o_ref.dtype)


def prepare_params(w1, b1, w2, b2):
    """One-time param prep (outside the hot path): bf16 cast + lane-dense padding."""
    w1p = w1.astype(jnp.bfloat16)                                # (784, 32) bf16
    b1p = b1.reshape(1, HID_DIM).astype(jnp.float32)             # (1, 32)   f32
    w2p = jnp.zeros((HID_DIM, OUT_PAD), jnp.bfloat16).at[:, :OUT_DIM].set(
        w2.astype(jnp.bfloat16))                                 # (32, 128) bf16
    b2p = jnp.zeros((1, OUT_PAD), jnp.float32).at[0, :OUT_DIM].set(b2)  # (1, 128)
    return w1p, b1p, w2p, b2p


@functools.partial(jax.jit, static_argnames=("tm",))
def mlp_forward(x, w1p, b1p, w2p, b2p, tm=DEFAULT_TM):
    """x: any shape flattening to (B, 784) f32. Returns (B, 10) f32 logits."""
    x2d = x.reshape(-1, IN_DIM)
    B = x2d.shape[0]

    # Batch tiling: no padding, no wrapper-side dtype cast. For small batches a
    # single block equal to the full array dims is always legal; for large
    # batches the (multiple-of-8) tile's final partial block is masked by Pallas.
    if B <= tm:
        tm_eff = B
    else:
        tm_eff = tm
    grid = (pl.cdiv(B, tm_eff),)

    out = pl.pallas_call(
        mlp_kernel,
        out_shape=jax.ShapeDtypeStruct((B, OUT_PAD), jnp.bfloat16),
        grid=grid,
        in_specs=[
            pl.BlockSpec((tm_eff, IN_DIM), lambda i: (i, 0)),     # x: tiled on batch
            pl.BlockSpec((IN_DIM, HID_DIM), lambda i: (0, 0)),    # w1: resident
            pl.BlockSpec((1, HID_DIM), lambda i: (0, 0)),         # b1: resident
            pl.BlockSpec((HID_DIM, OUT_PAD), lambda i: (0, 0)),   # w2: resident
            pl.BlockSpec((1, OUT_PAD), lambda i: (0, 0)),         # b2: resident
        ],
        out_specs=pl.BlockSpec((tm_eff, OUT_PAD), lambda i: (i, 0)),
        compiler_params=pltpu.CompilerParams(
            dimension_semantics=("parallel",),    # megacore sharding on v7x
            vmem_limit_bytes=VMEM_LIMIT_BYTES,
        ),
    )(x2d, w1p, b1p, w2p, b2p)

    # Drop the lane-padding columns; return f32 to match nn.Linear output dtype.
    # TODO(synk): for tiny batches (B < ~256) a plain jnp path avoids kernel
    # launch overhead; kept in-kernel here for a single code path.
    return out[:, :OUT_DIM].astype(jnp.float32)


def init_params(key):
    # Deterministic init mimicking nn.Linear's uniform(-1/sqrt(fan_in), 1/sqrt(fan_in)).
    # Weights are stored as (in_features, out_features): y = x @ W + b.
    k1, k2, k3, k4 = jax.random.split(key, 4)
    bound1 = 1.0 / jnp.sqrt(float(IN_DIM))
    bound2 = 1.0 / jnp.sqrt(float(HID_DIM))
    w1 = jax.random.uniform(k1, (IN_DIM, HID_DIM), jnp.float32, -bound1, bound1)
    b1 = jax.random.uniform(k2, (HID_DIM,), jnp.float32, -bound1, bound1)
    w2 = jax.random.uniform(k3, (HID_DIM, OUT_DIM), jnp.float32, -bound2, bound2)
    b2 = jax.random.uniform(k4, (OUT_DIM,), jnp.float32, -bound2, bound2)
    return w1, b1, w2, b2


if __name__ == "__main__":
    key = jax.random.PRNGKey(0)
    pkey, xkey = jax.random.split(key)
    w1, b1, w2, b2 = init_params(pkey)
    w1p, b1p, w2p, b2p = prepare_params(w1, b1, w2, b2)

    # Example input: batch of 2 MNIST-like images, NCHW (2, 1, 28, 28), f32.
    x = jax.random.normal(xkey, (2, 1, 28, 28), jnp.float32)

    out = mlp_forward(x, w1p, b1p, w2p, b2p)
    out = jax.block_until_ready(out)
    assert out.shape == (2, OUT_DIM)

    # Reference in plain JAX following the same numeric path
    # (bf16 matmul inputs, f32 accumulation, bf16 final store).
    x2d = x.reshape(-1, IN_DIM)
    h_ref = jnp.maximum(
        jnp.dot(x2d.astype(jnp.bfloat16), w1.astype(jnp.bfloat16),
                preferred_element_type=jnp.float32) + b1, 0.0)
    y_ref = jnp.dot(h_ref.astype(jnp.bfloat16), w2.astype(jnp.bfloat16),
                    preferred_element_type=jnp.float32) + b2
    ref = y_ref.astype(jnp.bfloat16).astype(jnp.float32)
    assert jnp.allclose(out, ref, atol=2e-2, rtol=2e-2), (
        f"max abs err {jnp.max(jnp.abs(out - ref))}")

    print("KERNEL_OK")
</pallas_src>

<mosaic_0001>
module attributes {stable_mosaic.version = 11 : i64} {
  func.func @mlp_kernel(%arg0: i32, %arg1: memref<2x784xf32, #tpu.memory_space<vmem>>, %arg2: memref<784x32xbf16, #tpu.memory_space<vmem>>, %arg3: memref<1x32xf32, #tpu.memory_space<vmem>>, %arg4: memref<32x128xbf16, #tpu.memory_space<vmem>>, %arg5: memref<1x128xf32, #tpu.memory_space<vmem>>, %arg6: memref<2x128xbf16, #tpu.memory_space<vmem>>) attributes {dimension_semantics = [#tpu.dimension_semantics<parallel>], iteration_bounds = array<i64: 1>, scalar_prefetch = 0 : i64, scratch_operands = 0 : i64, tpu.core_type = #tpu.core_type<tc>, window_params = [{transform_indices = @transform_0, window_bounds = array<i64: 2, 784>}, {pipeline_mode = #tpu.pipeline_mode<synchronous>, transform_indices = @transform_1, window_bounds = array<i64: 784, 32>}, {pipeline_mode = #tpu.pipeline_mode<synchronous>, transform_indices = @transform_2, window_bounds = array<i64: 1, 32>}, {pipeline_mode = #tpu.pipeline_mode<synchronous>, transform_indices = @transform_3, window_bounds = array<i64: 32, 128>}, {pipeline_mode = #tpu.pipeline_mode<synchronous>, transform_indices = @transform_4, window_bounds = array<i64: 1, 128>}, {transform_indices = @transform_5, window_bounds = array<i64: 2, 128>}]} {
    %c0 = arith.constant 0 : index
    %c0_0 = arith.constant 0 : index
    %0 = vector.load %arg1[%c0, %c0_0] : memref<2x784xf32, #tpu.memory_space<vmem>>, vector<2x784xf32>
    %1 = arith.truncf %0 : vector<2x784xf32> to vector<2x784xbf16>
    %c0_1 = arith.constant 0 : index
    %c0_2 = arith.constant 0 : index
    %2 = vector.load %arg2[%c0_1, %c0_2] : memref<784x32xbf16, #tpu.memory_space<vmem>>, vector<784x32xbf16>
    %cst = arith.constant dense<0.000000e+00> : vector<2x32xf32>
    %3 = tpu.matmul %1, %2, %cst {dimension_numbers = #tpu.dot_dimension_numbers<[1], [0], [0], [1], [0, 0, 1, 1], [], []>} : vector<2x784xbf16>, vector<784x32xbf16>, vector<2x32xf32> -> vector<2x32xf32>
    %c0_3 = arith.constant 0 : index
    %c0_4 = arith.constant 0 : index
    %4 = vector.load %arg3[%c0_3, %c0_4] : memref<1x32xf32, #tpu.memory_space<vmem>>, vector<1x32xf32>
    %5 = vector.broadcast %4 : vector<1x32xf32> to vector<2x32xf32>
    %6 = arith.addf %3, %5 : vector<2x32xf32>
    %cst_5 = arith.constant 0.000000e+00 : f32
    %7 = vector.broadcast %cst_5 : f32 to vector<2x32xf32>
    %8 = arith.maximumf %6, %7 : vector<2x32xf32>
    %9 = arith.truncf %8 : vector<2x32xf32> to vector<2x32xbf16>
    %c0_6 = arith.constant 0 : index
    %c0_7 = arith.constant 0 : index
    %10 = vector.load %arg4[%c0_6, %c0_7] : memref<32x128xbf16, #tpu.memory_space<vmem>>, vector<32x128xbf16>
    %cst_8 = arith.constant dense<0.000000e+00> : vector<2x128xf32>
    %11 = tpu.matmul %9, %10, %cst_8 {dimension_numbers = #tpu.dot_dimension_numbers<[1], [0], [0], [1], [0, 0, 1, 1], [], []>} : vector<2x32xbf16>, vector<32x128xbf16>, vector<2x128xf32> -> vector<2x128xf32>
    %c0_9 = arith.constant 0 : index
    %c0_10 = arith.constant 0 : index
    %12 = vector.load %arg5[%c0_9, %c0_10] : memref<1x128xf32, #tpu.memory_space<vmem>>, vector<1x128xf32>
    %13 = vector.broadcast %12 : vector<1x128xf32> to vector<2x128xf32>
    %14 = arith.addf %11, %13 : vector<2x128xf32>
    %15 = arith.truncf %14 : vector<2x128xf32> to vector<2x128xbf16>
    %c0_11 = arith.constant 0 : index
    %c0_12 = arith.constant 0 : index
    %16 = vector.load %arg6[%c0_11, %c0_12] : memref<2x128xbf16, #tpu.memory_space<vmem>>, vector<2x128xbf16>
    tpu.vector_store %arg6[%c0_11, %c0_12], %15 {strides = array<i32>} : memref<2x128xbf16, #tpu.memory_space<vmem>>, vector<2x128xbf16>,
    return
  }
  func.func @transform_0(%arg0: i32) -> (i32, i32) {
    %c0_i32 = arith.constant 0 : i32
    %c0_i32_0 = arith.constant 0 : i32
    return %arg0, %c0_i32 : i32, i32
  }
  func.func @transform_1(%arg0: i32) -> (i32, i32) {
    %c0_i32 = arith.constant 0 : i32
    %c0_i32_0 = arith.constant 0 : i32
    %c0_i32_1 = arith.constant 0 : i32
    return %c0_i32, %c0_i32_0 : i32, i32
  }
  func.func @transform_2(%arg0: i32) -> (i32, i32) {
    %c0_i32 = arith.constant 0 : i32
    %c0_i32_0 = arith.constant 0 : i32
    %c0_i32_1 = arith.constant 0 : i32
    return %c0_i32, %c0_i32_0 : i32, i32
  }
  func.func @transform_3(%arg0: i32) -> (i32, i32) {
    %c0_i32 = arith.constant 0 : i32
    %c0_i32_0 = arith.constant 0 : i32
    %c0_i32_1 = arith.constant 0 : i32
    return %c0_i32, %c0_i32_0 : i32, i32
  }
  func.func @transform_4(%arg0: i32) -> (i32, i32) {
    %c0_i32 = arith.constant 0 : i32
    %c0_i32_0 = arith.constant 0 : i32
    %c0_i32_1 = arith.constant 0 : i32
    return %c0_i32, %c0_i32_0 : i32, i32
  }
  func.func @transform_5(%arg0: i32) -> (i32, i32) {
    %c0_i32 = arith.constant 0 : i32
    %c0_i32_0 = arith.constant 0 : i32
    return %arg0, %c0_i32 : i32, i32
  }
}

</mosaic_0001>

<bundles_post_ra>
// kernel: mlp_forward.1
= control target key start
LH: loop header
LB: loop body
LE: loop exit
PB: predicated region body
PF: predicated region fallthrough
CT: control target
= control target key end

     0   :  { %v906_v21 = vmov 1983009808   ;;  %v29_v23 = vlaneseq  ;;  %v907_v47 = vmov 0.0   ;;  %vm908_vm0 = vmmov 0   ;;  %s1109_s1 = inlined_call_operand.vmem [shape: bf16[784,32], index: 1, kind: input, shape index: {}]   ;;  %s1110_s0 = inlined_call_operand.vmem [shape: f32[2,784], index: 0, kind: input, shape index: {}]   ;;  %s1111_s3 = inlined_call_operand.vmem [shape: bf16[32,128], index: 3, kind: input, shape index: {}]   ;;  %s1112_s2 = inlined_call_operand.vmem [shape: f32[1,32], index: 2, kind: input, shape index: {}]   ;;  %s1113_s4 = inlined_call_operand.vmem [shape: f32[1,128], index: 4, kind: input, shape index: {}]   ;;  %s1114_s5 = inlined_call_operand.vmem [shape: bf16[2,128], index: 5, kind: output, shape index: {}]  }
   0x1   :  { %v853_v0 = vld [vmem:[%s1109_s1 + $0x78] sm:$0xff]   ;;  %v857_v4 = vld [vmem:[%s1109_s1 + $0x70] sm:$0xff]   ;;  %v861_v8 = vld [vmem:[%s1109_s1 + $0x68] sm:$0xff]   ;;  %v27_v22 = vunpack.c.l.s4 %v906_v21  ;;  %vm471_vm1 = vcmask 130048   ;;  %vm660_vm2 = vcmask 261120  }
   0x2   :  { %v854_v1 = vld [vmem:[%s1109_s1 + $0x38] sm:$0xff]   ;;  %765 = vmatprep.subr.bf16.mxu0 %v853_v0  ;;  %v858_v5 = vld [vmem:[%s1109_s1 + $0x30] sm:$0xff]   ;;  %v862_v9 = vld [vmem:[%s1109_s1 + $0x28] sm:$0xff]   ;;  %v30_v29 = vshrl.u32 %v29_v23, 7 }
   0x3   :  { %v855_v2 = vld [vmem:[%s1109_s1 + $0xf8] sm:$0xff]   ;;  %766 = vmatpush3.bf16.msra.mxu0 %v854_v1  ;;  %v859_v6 = vld [vmem:[%s1109_s1 + $0xf0] sm:$0xff]   ;;  %v863_v10 = vld [vmem:[%s1109_s1 + $0xe8] sm:$0xff]   ;;  %v28_v28 = vunpack.c.0.s8 %v27_v22 }
   0x4   :  { %v856_v3 = vld [vmem:[%s1109_s1 + $0xb8] sm:$0xff]   ;;  %787 = vmatprep.subr.bf16.mxu1 %v855_v2  ;;  %767 = vmatprep.subr.bf16.mxu0 %v857_v4  ;;  %v860_v7 = vld [vmem:[%s1109_s1 + $0xb0] sm:$0xff]   ;;  %v864_v11 = vld [vmem:[%s1109_s1 + $0xa8] sm:$0xff]  }
   0x5   :  { %788 = vmatpush3.bf16.msra.mxu1 %v856_v3  ;;  %v865_v12 = vld [vmem:[%s1109_s1 + $0x60] sm:$0xff]   ;;  %v869_v16 = vld [vmem:[%s1109_s1 + $0x58] sm:$0xff]   ;;  %v873_v20 = vld [vmem:[%s1109_s1 + $0x50] sm:$0xff]   ;;  %v31_v34 = vsub.s32 %v28_v28, %v30_v29 }
   0x6   :  { %789 = vmatprep.subr.bf16.mxu1 %v859_v6  ;;  %v866_v13 = vld [vmem:[%s1109_s1 + $0x20] sm:$0xff]   ;;  %v870_v17 = vld [vmem:[%s1109_s1 + $0x18] sm:$0xff]   ;;  %v874_v24 = vld [vmem:[%s1109_s1 + $0x10] sm:$0xff]  }
   0x7   :  { %768 = vmatpush3.bf16.msra.mxu0 %v858_v5  ;;  %v867_v14 = vld [vmem:[%s1109_s1 + $0xe0] sm:$0xff]   ;;  %v871_v18 = vld [vmem:[%s1109_s1 + $0xd8] sm:$0xff]   ;;  %v875_v25 = vld [vmem:[%s1109_s1 + $0xd0] sm:$0xff]  }
   0x8   :  { %769 = vmatprep.subr.bf16.mxu0 %v861_v8  ;;  %v868_v15 = vld [vmem:[%s1109_s1 + $0xa0] sm:$0xff]   ;;  %v872_v19 = vld [vmem:[%s1109_s1 + $0x98] sm:$0xff]   ;;  %v876_v26 = vld [vmem:[%s1109_s1 + $0x90] sm:$0xff]  }
   0x9   :  { %790 = vmatpush3.bf16.msra.mxu1 %v860_v7  ;;  %v877_v27 = vld [vmem:[%s1109_s1 + $0x48] sm:$0xff]   ;;  %v881_v33 = vld [vmem:[%s1109_s1 + $0x40] sm:$0xff]   ;;  %v886_v43 = vld [vmem:[%s1109_s1 + $0x178] sm:$0xff]  }
   0xa   :  { %791 = vmatprep.subr.bf16.mxu1 %v863_v10  ;;  %v878_v30 = vld [vmem:[%s1109_s1 + $0x8] sm:$0xff]   ;;  %v882_v35 = vld [vmem:[%s1109_s1] sm:$0xff]   ;;  %v888_v51 = vld [vmem:[%s1109_s1 + $0x138] sm:$0xff]  }
   0xb   :  { %770 = vmatpush3.bf16.msra.mxu0 %v862_v9  ;;  %v879_v31 = vld [vmem:[%s1109_s1 + $0xc8] sm:$0xff]   ;;  %v883_v36 = vld [vmem:[%s1109_s1 + $0xc0] sm:$0xff]   ;;  %v889_v53 = vld [vmem:[%s1109_s1 + $0x170] sm:$0xff]  }
   0xc   :  { %771 = vmatprep.subr.bf16.mxu0 %v865_v12  ;;  %v880_v32 = vld [vmem:[%s1109_s1 + $0x88] sm:$0xff]   ;;  %v21_v37 = vld [vmem:[%s1110_s0] sm:$0xff]  ;;  %v890_v56 = vld [vmem:[%s1109_s1 + $0x130] sm:$0xff]  }
   0xd   :  { %792 = vmatpush3.bf16.msra.mxu1 %v864_v11  ;;  %v22_v38 = vld [vmem:[%s1110_s0 + $0x8] sm:$0x3f]  ;;  %v32_v39 = vrot.slane %v21_v37, %v31_v34  ;;  %v885_v40 = vld [vmem:[%s1109_s1 + $0x80] sm:$0xff]   ;;  %v25_v41 = vcombine.high %v21_v37, %v21_v37  ;;  %v895_v63 = vld [vmem:[%s1109_s1 + $0x158] sm:$0xff]  }
   0xe   :  { %793 = vmatprep.subr.bf16.mxu1 %v867_v14  ;;  %v49_v42 = vrot.slane %v22_v38, %v31_v34  ;;  %v891_v57 = vld [vmem:[%s1109_s1 + $0x168] sm:$0xff]   ;;  %v42_v58 = vcombine.high %v22_v38, %v22_v38  ;;  %v893_v60 = vld [vmem:[%s1109_s1 + $0x160] sm:$0xff]   ;;  %v896_v2 = vld [vmem:[%s1109_s1 + $0x118] sm:$0xff]  }
   0xf   :  { %772 = vmatpush3.bf16.msra.mxu0 %v866_v13  ;;  %v40_v44 = vcombine.high %v32_v39, %v32_v39  ;;  %v39_v45 = vrot.slane %v25_v41, %v31_v34  ;;  %v65_v46 = vpack.c.bf16 %v32_v39, %v32_v39  ;;  %v892_v59 = vld [vmem:[%s1109_s1 + $0x128] sm:$0xff]   ;;  %v894_v62 = vld [vmem:[%s1109_s1 + $0x120] sm:$0xff]   ;;  %v897_v3 = vld [vmem:[%s1109_s1 + $0x150] sm:$0xff]  }
  0x10   :  { %773 = vmatprep.subr.bf16.mxu0 %v869_v16  ;;  %v57_v48 = vcombine.high %v49_v42, %v49_v42  ;;  %v56_v61 = vrot.slane %v42_v58, %v31_v34  ;;  %v903_v0 = vld [vmem:[%s1109_s1 + $0x180] sm:$0xff]   ;;  %v898_v4 = vld [vmem:[%s1109_s1 + $0x110] sm:$0xff]   ;;  %v899_v5 = vld [vmem:[%s1109_s1 + $0x148] sm:$0xff]   ;;  %v69_v9 = vpack.c.bf16 %v49_v42, %v49_v42 }
  0x11   :  { %794 = vmatpush3.bf16.msra.mxu1 %v868_v15  ;;  %v66_v49 = vpack.c.bf16 %v40_v44, %v40_v44  ;;  %v41_v50 = vcombine.high %v39_v45, %v39_v45  ;;  %v67_v52 = vpack.c.bf16 %v39_v45, %v39_v45  ;;  %v900_v6 = vld [vmem:[%s1109_s1 + $0x108] sm:$0xff]   ;;  %v901_v7 = vld [vmem:[%s1109_s1 + $0x140] sm:$0xff]  }
  0x12   :  { %795 = vmatprep.subr.bf16.mxu1 %v871_v18  ;;  %v70_v55 = vpack.c.bf16 %v57_v48, %v57_v48  ;;  %v71_v1 = vpack.c.bf16 %v56_v61, %v56_v61  ;;  %v902_v8 = vld [vmem:[%s1109_s1 + $0x100] sm:$0xff]   ;;  %v904_v10 = vld [vmem:[%s1111_s3 + $0x8] sm:$0xff]  }
  0x13   :  { %774 = vmatpush3.bf16.msra.mxu0 %v870_v17  ;;  %507 = vmatprep.mubr.bf16.mxu0 %v66_v49  ;;  %v68_v54 = vpack.c.bf16 %v41_v50, %v41_v50  ;;  %v905_v11 = vld [vmem:[%s1111_s3] sm:$0xff]  }
  0x14   :  { %775 = vmatprep.subr.bf16.mxu0 %v873_v20  ;;  %v761_v38 = vld [vmem:[%s1113_s4] ss:$0 sm:$0xff] }
  0x15   :  { %796 = vmatpush3.bf16.msra.mxu1 %v872_v19  ;;  %547 = vmatprep.mubr.bf16.mxu1 %v68_v54 }
  0x16   :  { %797 = vmatprep.subr.bf16.mxu1 %v875_v25  ;;  %v710_v25 = vld [vmem:[%s1112_s2] ss:$0 sm:$0xff] }
  0x17   :  { %776 = vmatpush3.bf16.msra.mxu0 %v874_v24 }
  0x18   :  { %777 = vmatprep.subr.bf16.mxu0 %v877_v27 }
  0x19   :  { %798 = vmatpush3.bf16.msra.mxu1 %v876_v26 }
  0x1a   :  { %799 = vmatprep.subr.bf16.mxu1 %v879_v31 }
  0x1b   :  { %778 = vmatpush3.bf16.msra.mxu0 %v878_v30 }
  0x1c   :  { %779 = vmatprep.subr.bf16.mxu0 %v881_v33 }
  0x1d   :  { %800 = vmatpush3.bf16.msra.mxu1 %v880_v32 }
  0x1e   :  { %801 = vmatprep.subr.bf16.mxu1 %v883_v36 }
  0x1f   :  { %780 = vmatpush3.bf16.msra.mxu0 %v882_v35 }
  0x20   :  { %809 = vmatprep.subr.bf16.mxu0 %v886_v43 }
  0x21   :  { %802 = vmatpush3.bf16.msra.mxu1 %v885_v40 }
  0x22   :  { %836 = vmatprep.subr.bf16.mxu1 %v907_v47  ;;  %508 = vmatmul.mubr.bf16.vlgmr.msra.gmra.mxu0 %v65_v46 }
  0x23   :  { %810 = vmatpush3.bf16.msra.mxu0 %v888_v51  ;;  %587 = vmatprep.mubr.bf16.mxu0 %v70_v55 }
  0x24   :  { %548 = vmatmul.mubr.bf16.vlgmr.msra.gmra.mxu1 %v67_v52  ;;  %811 = vmatprep.subr.bf16.mxu0 %v889_v53 }
  0x25   :  { %838 = vmatprep.mubr.msk.bf16.mxu1 %vm908_vm0, %v907_v47  ;;  %837 = vmatpush3.bf16.msra.mxu1 %v903_v0 }
  0x26   :  { %842 = vmatprep.subr.bf16.mxu1 %v907_v47 }
  0x27   :  { %812 = vmatpush3.bf16.msra.mxu0 %v890_v56 }
  0x28   :  { %813 = vmatprep.subr.bf16.mxu0 %v891_v57 }
  0x2b   :  { %814 = vmatpush3.bf16.msra.mxu0 %v892_v59 }
  0x2c   :  { %815 = vmatprep.subr.bf16.mxu0 %v893_v60  ;;  %839 = vmatmul.mubr.msk.bf16.vlgmr.msra.gmra.mxu1 %vm471_vm1, %v71_v1 }
  0x2d   :  { %846 = vmatprep.mubr.msk.bf16.mxu1 %vm908_vm0, %v907_v47  ;;  %843 = vmatpush3.bf16.msra.mxu1 %v904_v10 }
  0x2e   :  { %844 = vmatprep.subr.bf16.mxu1 %v907_v47 }
  0x2f   :  { %816 = vmatpush3.bf16.msra.mxu0 %v894_v62 }
  0x30   :  { %817 = vmatprep.subr.bf16.mxu0 %v895_v63 }
  0x31   :  { %845 = vmatpush3.bf16.msra.mxu1 %v905_v11 }
  0x33   :  { %818 = vmatpush3.bf16.msra.mxu0 %v896_v2 }
  0x34   :  { %819 = vmatprep.subr.bf16.mxu0 %v897_v3 }
  0x37   :  { %820 = vmatpush3.bf16.msra.mxu0 %v898_v4 }
  0x38   :  { %821 = vmatprep.subr.bf16.mxu0 %v899_v5 }
  0x3b   :  { %822 = vmatpush3.bf16.msra.mxu0 %v900_v6 }
  0x3c   :  { %823 = vmatprep.subr.bf16.mxu0 %v901_v7 }
  0x3f   :  { %824 = vmatpush3.bf16.msra.mxu0 %v902_v8 }
  0x42   :  { %588 = vmatmul.mubr.bf16.vlgmr.msra.gmra.mxu0 %v69_v9 }
  0xe2   :  { %v781_v12 = vpop.f32.mrf.mxu0 }
  0xe4   :  { %v782_v13 = vpop.f32.mrf.mxu0  ;;  %v803_v14 = vpop.f32.mrf.mxu1 }
  0xe5   :  { %v783_v24 = vadd.f32 %v782_v13, %v781_v12 }
  0xe6   :  { %v784_v15 = vpop.f32.mrf.mxu0  ;;  %v804_v16 = vpop.f32.mrf.mxu1 }
  0xe7   :  { %v510_v26 = vadd.f32 %v783_v24, %v710_v25  ;;  %v805_v27 = vadd.f32 %v804_v16, %v803_v14 }
  0xe8   :  { %v785_v17 = vpop.f32.mrf.mxu0  ;;  %v806_v18 = vpop.f32.mrf.mxu1 }
  0xe9   :  { %v550_v30 = vadd.f32 %v805_v27, %v510_v26 }
  0xea   :  { %v807_v19 = vpop.f32.mrf.mxu1 }
  0xec   :  { %v629_v20 = vpop.f32.mrf.mxu1 }
  0xee   :  { %v840_v21 = vpop.f32.mrf.mxu1 }
  0xf0   :  { %v632_v22 = vpop.f32.mrf.mxu1 }
  0xf2   :  { %v841_v23 = vpop.f32.mrf.mxu1 }
 0x102   :  { %v825_v28 = vpop.f32.mrf.mxu0 }
 0x104   :  { %v826_v29 = vpop.f32.mrf.mxu0 }
 0x105   :  { %v827_v31 = vadd.f32 %v826_v29, %v825_v28 }
 0x106   :  { %v828_v32 = vpop.f32.mrf.mxu0 }
 0x107   :  { %v590_v33 = vadd.f32 %v827_v31, %v550_v30 }
 0x108   :  { %v829_v34 = vpop.f32.mrf.mxu0 }
 0x109   :  { %v630_v35 = vadd.f32 %v629_v20, %v590_v33 }
 0x10b   :  { %v635_v36 = vmax.f32 %v630_v35, 0.0 }
 0x10d   :  { %v636_v37 = vpack.c.bf16 %v635_v36, %v635_v36 }
 0x10f   :  { %847 = vmatmul.mubr.msk.bf16.vlgmr.msra.gmra.mxu1 %vm660_vm2, %v636_v37 }
 0x1cf   :  { %v698_v39 = vpop.f32.mrf.mxu1 }
 0x1d0   :  { %v699_v40 = vadd.f32 %v761_v38, %v698_v39 }
 0x1d1   :  { %v848_v41 = vpop.f32.mrf.mxu1 }
 0x1d2   :  { %v704_v42 = vpack.c.bf16 %v699_v40, %v699_v40 }
 0x1d3   :  { %v701_v43 = vpop.f32.mrf.mxu1 }
 0x1d4   :  { %705 = vst [vmem:[%s1114_s5] sm:$0x1] %v704_v42 }
 0x1d5   :  { %v849_v44 = vpop.f32.mrf.mxu1 }

</bundles_post_ra>
